<compile_context>
chip_gen: v7x
topology: tpu7x:2x2x1
jax: 0.10.0
libtpu: 0.0.40
codegen_flags: <defaults>
</compile_context>

<pallas_src>
import functools

import jax
import jax.numpy as jnp
from jax import lax
from jax.experimental import pallas as pl
from jax.experimental.pallas import tpu as pltpu


# ----------------------------------------------------------------------------
# Fused kernel.  Grid = (batch, S // tq).  Per step:
#   q_ref            : (1, tq, D)  bf16     (this q tile)
#   k_ref, v_ref     : (1, S,  D)  bf16     (full sequence; read only on qi==0)
#   wq_ref, wc_ref   : (D, D)      bf16     (pre-transposed: x @ w_t)
#   bq_ref, bc_ref   : (1, D)      f32
#   o_ref            : (1, 1, tq, D) f32
#   kp_ref, vp_ref   : (S, D)      bf16 scratch (projected K / V, per batch)
#   conc_ref         : (tq, D)     bf16 scratch (concatenated head outputs)
# ----------------------------------------------------------------------------
def _mha_fused_kernel(q_ref, k_ref, v_ref, wq_ref, bq_ref, wc_ref, bc_ref,
                      o_ref, kp_ref, vp_ref, conc_ref, *, head_num, scale):
    d = q_ref.shape[2]
    d_k = d // head_num

    # ---- project K and V once per batch (first q tile), keep them resident
    #      in bf16 VMEM scratch for all following q tiles of this batch.
    @pl.when(pl.program_id(1) == 0)
    def _():
        kp = jnp.dot(k_ref[0], wq_ref[...],
                     preferred_element_type=jnp.float32) + bq_ref[...]
        vp = jnp.dot(v_ref[0], wq_ref[...],
                     preferred_element_type=jnp.float32) + bq_ref[...]
        kp_ref[...] = kp.astype(kp_ref.dtype)
        vp_ref[...] = vp.astype(vp_ref.dtype)

    # ---- project this q tile; fold 1/sqrt(d_k) in here (one (tq, D) multiply
    #      instead of head_num * (tq, S) multiplies on the score tiles).
    qp = jnp.dot(q_ref[0], wq_ref[...],
                 preferred_element_type=jnp.float32) + bq_ref[...]
    qp = (qp * scale).astype(jnp.bfloat16)

    # ---- per-head scaled dot-product attention (static unroll; head slices
    #      are in-VMEM static slices, head outputs land at their column
    #      offsets in conc_ref -- no concatenate).
    for h in range(head_num):
        cols = slice(h * d_k, (h + 1) * d_k)
        q_h = qp[:, cols]                     # (tq, d_k) bf16
        k_h = kp_ref[:, cols]                 # (S,  d_k) bf16
        v_h = vp_ref[:, cols]                 # (S,  d_k) bf16

        # q_h @ k_h^T without materializing a transpose; f32 accumulation.
        scores = lax.dot_general(
            q_h, k_h, (((1,), (1,)), ((), ())),
            preferred_element_type=jnp.float32)          # (tq, S) f32

        # Softmax strictly in f32 (v5e has no bf16 VPU/EUP).
        scores = scores - jnp.max(scores, axis=-1, keepdims=True)
        p = jnp.exp(scores)
        denom = jnp.sum(p, axis=-1, keepdims=True)
        p = p * pl.reciprocal(denom, approx=True)        # EUP slot

        conc_ref[:, cols] = jnp.dot(
            p.astype(jnp.bfloat16), v_h,
            preferred_element_type=jnp.float32).astype(conc_ref.dtype)

    # ---- output projection (lin_concat); lane-dense store at width D.
    out = jnp.dot(conc_ref[...], wc_ref[...],
                  preferred_element_type=jnp.float32) + bc_ref[...]
    o_ref[0, 0] = out.astype(o_ref.dtype)


# ----------------------------------------------------------------------------
# Tiling / VMEM helpers
# ----------------------------------------------------------------------------
def _pick_q_tile(s):
    """Largest flash-style q tile that divides S; full S for tiny inputs."""
    for t in (512, 256, 128):
        if s % t == 0:
            return t
    return s


def _vmem_limit_bytes(s, d, tq):
    bf, f32 = 2, 4
    nbuf = 2  # pipeline double-buffering of inputs / outputs
    acts = nbuf * (tq * d * bf) + 2 * nbuf * (s * d * bf)        # q tile + K,V blocks
    weights = 2 * nbuf * (d * d * bf) + 2 * nbuf * (d * f32)     # wq, wc + biases
    outs = nbuf * (tq * d * f32)
    scratch = 2 * (s * d * bf) + (tq * d * bf)                   # kp, vp, conc
    work = 4 * (tq * d * f32) + 3 * (tq * s * f32)               # live f32 temporaries
    est = acts + weights + outs + scratch + work
    return int(min(max(2 * est, 16 * 1024 * 1024), 64 * 1024 * 1024))


# ----------------------------------------------------------------------------
# Wrapper
# ----------------------------------------------------------------------------
def multi_head_attention(params, q, k, v, head_num):
    """q, k, v: (B, S, D) float32.  Returns (1, B, S, D) float32."""
    b, s, d = q.shape
    assert d % head_num == 0, "model_dim must be divisible by head_num"
    d_k = d // head_num
    scale = 1.0 / (d_k ** 0.5)
    tq = _pick_q_tile(s)

    wq_t, bq = params["lin_q"]          # wq_t: (D_in, D_out) pre-transposed
    wc_t, bc = params["lin_concat"]

    # bf16 MXU inputs (halves HBM->VMEM traffic and VMEM footprint).
    q = q.astype(jnp.bfloat16)
    k = k.astype(jnp.bfloat16)
    v = v.astype(jnp.bfloat16)
    wq_t = wq_t.astype(jnp.bfloat16)
    wc_t = wc_t.astype(jnp.bfloat16)

    q_spec = pl.BlockSpec((1, tq, d), lambda bi, qi: (bi, qi, 0))
    kv_spec = pl.BlockSpec((1, s, d), lambda bi, qi: (bi, 0, 0))
    w_spec = pl.BlockSpec((d, d), lambda bi, qi: (0, 0))
    b_spec = pl.BlockSpec((1, d), lambda bi, qi: (0, 0))
    out_spec = pl.BlockSpec((1, 1, tq, d), lambda bi, qi: (0, bi, qi, 0))

    kernel = functools.partial(_mha_fused_kernel, head_num=head_num, scale=scale)

    return pl.pallas_call(
        kernel,
        out_shape=jax.ShapeDtypeStruct((1, b, s, d), jnp.float32),
        grid=(b, s // tq),
        in_specs=[q_spec, kv_spec, kv_spec, w_spec, b_spec, w_spec, b_spec],
        out_specs=out_spec,
        scratch_shapes=[
            pltpu.VMEM((s, d), jnp.bfloat16),   # projected K
            pltpu.VMEM((s, d), jnp.bfloat16),   # projected V
            pltpu.VMEM((tq, d), jnp.bfloat16),  # concatenated head outputs
        ],
        compiler_params=pltpu.CompilerParams(
            # batch: "parallel" -> shardable across v7x's 2 TensorCores;
            # q-tile axis carries the per-batch K/V scratch -> "arbitrary".
            dimension_semantics=("parallel", "arbitrary"),
            vmem_limit_bytes=_vmem_limit_bytes(s, d, tq)),
    )(q, k, v, wq_t, bq, wc_t, bc)


# ----------------------------------------------------------------------------
# Parameters (nn.Linear weights pre-transposed once to (D_in, D_out); biases
# kept f32 and 2-D).  lin_k / lin_v are created as in __init__ but, exactly as
# in the reference forward, never used.
# ----------------------------------------------------------------------------
def init_params(key, model_dim):
    ks = jax.random.split(key, 8)

    def lin(kw, kb):
        w = jax.random.normal(kw, (model_dim, model_dim), jnp.float32) * 0.1
        b = jax.random.normal(kb, (model_dim,), jnp.float32) * 0.1
        return w.T, b.reshape(1, model_dim)

    return {
        "lin_q": lin(ks[0], ks[1]),
        "lin_k": lin(ks[2], ks[3]),   # unused in forward (matches reference)
        "lin_v": lin(ks[4], ks[5]),   # unused in forward (matches reference)
        "lin_concat": lin(ks[6], ks[7]),
    }


# ----------------------------------------------------------------------------
# Pure-JAX f32 reference (same semantics as the PyTorch forward) for a loose
# sanity check against the bf16-MXU kernel.
# ----------------------------------------------------------------------------
def _mha_reference(params, q, k, v, head_num):
    wq_t, bq = params["lin_q"]
    wc_t, bc = params["lin_concat"]
    b, s, d = q.shape
    d_k = d // head_num

    def lin(x, w_t, bias):
        return x @ w_t + bias

    qp, kp, vp = lin(q, wq_t, bq), lin(k, wq_t, bq), lin(v, wq_t, bq)

    def split(x):
        return x.reshape(b, s, head_num, d_k).transpose(0, 2, 1, 3)

    qh, kh, vh = split(qp), split(kp), split(vp)
    scores = jnp.einsum("bhqd,bhkd->bhqk", qh, kh) / jnp.sqrt(float(d_k))
    p = jax.nn.softmax(scores, axis=-1)
    attn = jnp.einsum("bhqk,bhkd->bhqd", p, vh)
    conc = attn.transpose(0, 2, 1, 3).reshape(b, s, d)
    return (conc @ wc_t + bc)[None]


if __name__ == "__main__":
    model_dim = 128   # lane-dense output width (last dim = 128)
    head_num = 4      # d_k = 32
    batch, seq = 2, 8

    key = jax.random.PRNGKey(0)
    kp_, kq, kk, kv = jax.random.split(key, 4)
    params = init_params(kp_, model_dim)

    q = jax.random.normal(kq, (batch, seq, model_dim), jnp.float32)
    k = jax.random.normal(kk, (batch, seq, model_dim), jnp.float32)
    v = jax.random.normal(kv, (batch, seq, model_dim), jnp.float32)

    out = multi_head_attention(params, q, k, v, head_num)
    jax.block_until_ready(out)

    assert out.shape == (1, batch, seq, model_dim)
    assert bool(jnp.all(jnp.isfinite(out)))

    # Loose sanity check vs. f32 reference (kernel runs the MXU in bf16).
    ref = _mha_reference(params, q, k, v, head_num)
    err = float(jnp.max(jnp.abs(out.astype(jnp.float32) - ref)))
    assert err < 0.25, f"max abs error vs reference too large: {err}"

    print("KERNEL_OK")
</pallas_src>

<mosaic_0001>
module attributes {stable_mosaic.version = 11 : i64} {
  func.func @_mha_fused_kernel(%arg0: i32, %arg1: i32, %arg2: memref<1x8x128xbf16, #tpu.memory_space<vmem>>, %arg3: memref<1x8x128xbf16, #tpu.memory_space<vmem>>, %arg4: memref<1x8x128xbf16, #tpu.memory_space<vmem>>, %arg5: memref<128x128xbf16, #tpu.memory_space<vmem>>, %arg6: memref<1x128xf32, #tpu.memory_space<vmem>>, %arg7: memref<128x128xbf16, #tpu.memory_space<vmem>>, %arg8: memref<1x128xf32, #tpu.memory_space<vmem>>, %arg9: memref<1x1x8x128xf32, #tpu.memory_space<vmem>>, %arg10: memref<8x128xbf16, #tpu.memory_space<vmem>>, %arg11: memref<8x128xbf16, #tpu.memory_space<vmem>>, %arg12: memref<8x128xbf16, #tpu.memory_space<vmem>>) attributes {dimension_semantics = [#tpu.dimension_semantics<parallel>, #tpu.dimension_semantics<arbitrary>], iteration_bounds = array<i64: 2, 1>, scalar_prefetch = 0 : i64, scratch_operands = 3 : i64, tpu.core_type = #tpu.core_type<tc>, window_params = [{transform_indices = @transform_0, window_bounds = array<i64: 1, 8, 128>}, {transform_indices = @transform_1, window_bounds = array<i64: 1, 8, 128>}, {transform_indices = @transform_2, window_bounds = array<i64: 1, 8, 128>}, {pipeline_mode = #tpu.pipeline_mode<synchronous>, transform_indices = @transform_3, window_bounds = array<i64: 128, 128>}, {pipeline_mode = #tpu.pipeline_mode<synchronous>, transform_indices = @transform_4, window_bounds = array<i64: 1, 128>}, {pipeline_mode = #tpu.pipeline_mode<synchronous>, transform_indices = @transform_5, window_bounds = array<i64: 128, 128>}, {pipeline_mode = #tpu.pipeline_mode<synchronous>, transform_indices = @transform_6, window_bounds = array<i64: 1, 128>}, {transform_indices = @transform_7, window_bounds = array<i64: 1, 1, 8, 128>}]} {
    %c0_i32 = arith.constant 0 : i32
    %0 = arith.cmpi eq, %arg1, %c0_i32 : i32
    %1 = arith.extui %0 : i1 to i32
    %c0_i32_0 = arith.constant 0 : i32
    %2 = arith.cmpi ne, %1, %c0_i32_0 : i32
    scf.if %2 {
      %c0_56 = arith.constant 0 : index
      %c0_57 = arith.constant 0 : index
      %c0_58 = arith.constant 0 : index
      %94 = vector.load %arg3[%c0_56, %c0_57, %c0_58] : memref<1x8x128xbf16, #tpu.memory_space<vmem>>, vector<1x8x128xbf16>
      %95 = vector.shape_cast %94 : vector<1x8x128xbf16> to vector<8x128xbf16>
      %c0_59 = arith.constant 0 : index
      %c0_60 = arith.constant 0 : index
      %96 = vector.load %arg5[%c0_59, %c0_60] : memref<128x128xbf16, #tpu.memory_space<vmem>>, vector<128x128xbf16>
      %cst_61 = arith.constant dense<0.000000e+00> : vector<8x128xf32>
      %97 = tpu.matmul %95, %96, %cst_61 {dimension_numbers = #tpu.dot_dimension_numbers<[1], [0], [0], [1], [0, 0, 1, 1], [], []>} : vector<8x128xbf16>, vector<128x128xbf16>, vector<8x128xf32> -> vector<8x128xf32>
      %c0_62 = arith.constant 0 : index
      %c0_63 = arith.constant 0 : index
      %98 = vector.load %arg6[%c0_62, %c0_63] : memref<1x128xf32, #tpu.memory_space<vmem>>, vector<1x128xf32>
      %99 = vector.broadcast %98 : vector<1x128xf32> to vector<8x128xf32>
      %100 = arith.addf %97, %99 : vector<8x128xf32>
      %c0_64 = arith.constant 0 : index
      %c0_65 = arith.constant 0 : index
      %c0_66 = arith.constant 0 : index
      %101 = vector.load %arg4[%c0_64, %c0_65, %c0_66] : memref<1x8x128xbf16, #tpu.memory_space<vmem>>, vector<1x8x128xbf16>
      %102 = vector.shape_cast %101 : vector<1x8x128xbf16> to vector<8x128xbf16>
      %c0_67 = arith.constant 0 : index
      %c0_68 = arith.constant 0 : index
      %103 = vector.load %arg5[%c0_67, %c0_68] : memref<128x128xbf16, #tpu.memory_space<vmem>>, vector<128x128xbf16>
      %cst_69 = arith.constant dense<0.000000e+00> : vector<8x128xf32>
      %104 = tpu.matmul %102, %103, %cst_69 {dimension_numbers = #tpu.dot_dimension_numbers<[1], [0], [0], [1], [0, 0, 1, 1], [], []>} : vector<8x128xbf16>, vector<128x128xbf16>, vector<8x128xf32> -> vector<8x128xf32>
      %c0_70 = arith.constant 0 : index
      %c0_71 = arith.constant 0 : index
      %105 = vector.load %arg6[%c0_70, %c0_71] : memref<1x128xf32, #tpu.memory_space<vmem>>, vector<1x128xf32>
      %106 = vector.broadcast %105 : vector<1x128xf32> to vector<8x128xf32>
      %107 = arith.addf %104, %106 : vector<8x128xf32>
      %108 = arith.truncf %100 : vector<8x128xf32> to vector<8x128xbf16>
      %c0_72 = arith.constant 0 : index
      %c0_73 = arith.constant 0 : index
      %109 = vector.load %arg10[%c0_72, %c0_73] : memref<8x128xbf16, #tpu.memory_space<vmem>>, vector<8x128xbf16>
      tpu.vector_store %arg10[%c0_72, %c0_73], %108 {strides = array<i32>} : memref<8x128xbf16, #tpu.memory_space<vmem>>, vector<8x128xbf16>,
      %110 = arith.truncf %107 : vector<8x128xf32> to vector<8x128xbf16>
      %c0_74 = arith.constant 0 : index
      %c0_75 = arith.constant 0 : index
      %111 = vector.load %arg11[%c0_74, %c0_75] : memref<8x128xbf16, #tpu.memory_space<vmem>>, vector<8x128xbf16>
      tpu.vector_store %arg11[%c0_74, %c0_75], %110 {strides = array<i32>} : memref<8x128xbf16, #tpu.memory_space<vmem>>, vector<8x128xbf16>,
    } else {
    }
    %c0 = arith.constant 0 : index
    %c0_1 = arith.constant 0 : index
    %c0_2 = arith.constant 0 : index
    %3 = vector.load %arg2[%c0, %c0_1, %c0_2] : memref<1x8x128xbf16, #tpu.memory_space<vmem>>, vector<1x8x128xbf16>
    %4 = vector.shape_cast %3 : vector<1x8x128xbf16> to vector<8x128xbf16>
    %c0_3 = arith.constant 0 : index
    %c0_4 = arith.constant 0 : index
    %5 = vector.load %arg5[%c0_3, %c0_4] : memref<128x128xbf16, #tpu.memory_space<vmem>>, vector<128x128xbf16>
    %cst = arith.constant dense<0.000000e+00> : vector<8x128xf32>
    %6 = tpu.matmul %4, %5, %cst {dimension_numbers = #tpu.dot_dimension_numbers<[1], [0], [0], [1], [0, 0, 1, 1], [], []>} : vector<8x128xbf16>, vector<128x128xbf16>, vector<8x128xf32> -> vector<8x128xf32>
    %c0_5 = arith.constant 0 : index
    %c0_6 = arith.constant 0 : index
    %7 = vector.load %arg6[%c0_5, %c0_6] : memref<1x128xf32, #tpu.memory_space<vmem>>, vector<1x128xf32>
    %8 = vector.broadcast %7 : vector<1x128xf32> to vector<8x128xf32>
    %9 = arith.addf %6, %8 : vector<8x128xf32>
    %cst_7 = arith.constant 0.176776692 : f32
    %10 = vector.broadcast %cst_7 : f32 to vector<8x128xf32>
    %11 = arith.mulf %9, %10 : vector<8x128xf32>
    %12 = arith.truncf %11 : vector<8x128xf32> to vector<8x128xbf16>
    %13 = vector.extract_strided_slice %12 {offsets = [0, 0], sizes = [8, 32], strides = [1, 1]} : vector<8x128xbf16> to vector<8x32xbf16>
    %c0_8 = arith.constant 0 : index
    %c0_9 = arith.constant 0 : index
    %14 = vector.load %arg10[%c0_8, %c0_9] : memref<8x128xbf16, #tpu.memory_space<vmem>>, vector<8x32xbf16>
    %c0_10 = arith.constant 0 : index
    %c0_11 = arith.constant 0 : index
    %15 = vector.load %arg11[%c0_10, %c0_11] : memref<8x128xbf16, #tpu.memory_space<vmem>>, vector<8x32xbf16>
    %cst_12 = arith.constant dense<0.000000e+00> : vector<8x8xf32>
    %16 = tpu.matmul %13, %14, %cst_12 {dimension_numbers = #tpu.dot_dimension_numbers<[1], [1], [0], [0], [0, 0, 1, 0], [], []>} : vector<8x32xbf16>, vector<8x32xbf16>, vector<8x8xf32> -> vector<8x8xf32>
    %cst_13 = arith.constant dense<0xFF800000> : vector<8xf32>
    %17 = vector.multi_reduction <maximumf>, %16, %cst_13 [1] : vector<8x8xf32> to vector<8xf32>
    %18 = vector.shape_cast %17 : vector<8xf32> to vector<8x1xf32>
    %19 = vector.broadcast %18 : vector<8x1xf32> to vector<8x8xf32>
    %20 = arith.subf %16, %19 : vector<8x8xf32>
    %21 = math.exp %20 : vector<8x8xf32>
    %cst_14 = arith.constant dense<0.000000e+00> : vector<8xf32>
    %22 = vector.multi_reduction <add>, %21, %cst_14 [1] : vector<8x8xf32> to vector<8xf32>
    %23 = vector.shape_cast %22 : vector<8xf32> to vector<8x1xf32>
    %24 = tpu.reciprocal %23 {approx = true} : vector<8x1xf32> -> vector<8x1xf32>
    %25 = vector.broadcast %24 : vector<8x1xf32> to vector<8x8xf32>
    %26 = arith.mulf %21, %25 : vector<8x8xf32>
    %27 = arith.truncf %26 : vector<8x8xf32> to vector<8x8xbf16>
    %cst_15 = arith.constant dense<0.000000e+00> : vector<8x32xf32>
    %28 = tpu.matmul %27, %15, %cst_15 {dimension_numbers = #tpu.dot_dimension_numbers<[1], [0], [0], [1], [0, 0, 1, 1], [], []>} : vector<8x8xbf16>, vector<8x32xbf16>, vector<8x32xf32> -> vector<8x32xf32>
    %29 = arith.truncf %28 : vector<8x32xf32> to vector<8x32xbf16>
    %c0_16 = arith.constant 0 : index
    %c0_17 = arith.constant 0 : index
    %30 = vector.load %arg12[%c0_16, %c0_17] : memref<8x128xbf16, #tpu.memory_space<vmem>>, vector<8x32xbf16>
    tpu.vector_store %arg12[%c0_16, %c0_17], %29 {strides = array<i32>} : memref<8x128xbf16, #tpu.memory_space<vmem>>, vector<8x32xbf16>,
    %31 = vector.extract_strided_slice %12 {offsets = [0, 32], sizes = [8, 32], strides = [1, 1]} : vector<8x128xbf16> to vector<8x32xbf16>
    %c0_18 = arith.constant 0 : index
    %c32 = arith.constant 32 : index
    %32 = vector.load %arg10[%c0_18, %c32] : memref<8x128xbf16, #tpu.memory_space<vmem>>, vector<8x32xbf16>
    %c0_19 = arith.constant 0 : index
    %c32_20 = arith.constant 32 : index
    %33 = vector.load %arg11[%c0_19, %c32_20] : memref<8x128xbf16, #tpu.memory_space<vmem>>, vector<8x32xbf16>
    %cst_21 = arith.constant dense<0.000000e+00> : vector<8x8xf32>
    %34 = tpu.matmul %31, %32, %cst_21 {dimension_numbers = #tpu.dot_dimension_numbers<[1], [1], [0], [0], [0, 0, 1, 0], [], []>} : vector<8x32xbf16>, vector<8x32xbf16>, vector<8x8xf32> -> vector<8x8xf32>
    %cst_22 = arith.constant dense<0xFF800000> : vector<8xf32>
    %35 = vector.multi_reduction <maximumf>, %34, %cst_22 [1] : vector<8x8xf32> to vector<8xf32>
    %36 = vector.shape_cast %35 : vector<8xf32> to vector<8x1xf32>
    %37 = vector.broadcast %36 : vector<8x1xf32> to vector<8x8xf32>
    %38 = arith.subf %34, %37 : vector<8x8xf32>
    %39 = math.exp %38 : vector<8x8xf32>
    %cst_23 = arith.constant dense<0.000000e+00> : vector<8xf32>
    %40 = vector.multi_reduction <add>, %39, %cst_23 [1] : vector<8x8xf32> to vector<8xf32>
    %41 = vector.shape_cast %40 : vector<8xf32> to vector<8x1xf32>
    %42 = tpu.reciprocal %41 {approx = true} : vector<8x1xf32> -> vector<8x1xf32>
    %43 = vector.broadcast %42 : vector<8x1xf32> to vector<8x8xf32>
    %44 = arith.mulf %39, %43 : vector<8x8xf32>
    %45 = arith.truncf %44 : vector<8x8xf32> to vector<8x8xbf16>
    %cst_24 = arith.constant dense<0.000000e+00> : vector<8x32xf32>
    %46 = tpu.matmul %45, %33, %cst_24 {dimension_numbers = #tpu.dot_dimension_numbers<[1], [0], [0], [1], [0, 0, 1, 1], [], []>} : vector<8x8xbf16>, vector<8x32xbf16>, vector<8x32xf32> -> vector<8x32xf32>
    %47 = arith.truncf %46 : vector<8x32xf32> to vector<8x32xbf16>
    %c0_25 = arith.constant 0 : index
    %c32_26 = arith.constant 32 : index
    %48 = vector.load %arg12[%c0_25, %c32_26] : memref<8x128xbf16, #tpu.memory_space<vmem>>, vector<8x32xbf16>
    tpu.vector_store %arg12[%c0_25, %c32_26], %47 {strides = array<i32>} : memref<8x128xbf16, #tpu.memory_space<vmem>>, vector<8x32xbf16>,
    %49 = vector.extract_strided_slice %12 {offsets = [0, 64], sizes = [8, 32], strides = [1, 1]} : vector<8x128xbf16> to vector<8x32xbf16>
    %c0_27 = arith.constant 0 : index
    %c64 = arith.constant 64 : index
    %50 = vector.load %arg10[%c0_27, %c64] : memref<8x128xbf16, #tpu.memory_space<vmem>>, vector<8x32xbf16>
    %c0_28 = arith.constant 0 : index
    %c64_29 = arith.constant 64 : index
    %51 = vector.load %arg11[%c0_28, %c64_29] : memref<8x128xbf16, #tpu.memory_space<vmem>>, vector<8x32xbf16>
    %cst_30 = arith.constant dense<0.000000e+00> : vector<8x8xf32>
    %52 = tpu.matmul %49, %50, %cst_30 {dimension_numbers = #tpu.dot_dimension_numbers<[1], [1], [0], [0], [0, 0, 1, 0], [], []>} : vector<8x32xbf16>, vector<8x32xbf16>, vector<8x8xf32> -> vector<8x8xf32>
    %cst_31 = arith.constant dense<0xFF800000> : vector<8xf32>
    %53 = vector.multi_reduction <maximumf>, %52, %cst_31 [1] : vector<8x8xf32> to vector<8xf32>
    %54 = vector.shape_cast %53 : vector<8xf32> to vector<8x1xf32>
    %55 = vector.broadcast %54 : vector<8x1xf32> to vector<8x8xf32>
    %56 = arith.subf %52, %55 : vector<8x8xf32>
    %57 = math.exp %56 : vector<8x8xf32>
    %cst_32 = arith.constant dense<0.000000e+00> : vector<8xf32>
    %58 = vector.multi_reduction <add>, %57, %cst_32 [1] : vector<8x8xf32> to vector<8xf32>
    %59 = vector.shape_cast %58 : vector<8xf32> to vector<8x1xf32>
    %60 = tpu.reciprocal %59 {approx = true} : vector<8x1xf32> -> vector<8x1xf32>
    %61 = vector.broadcast %60 : vector<8x1xf32> to vector<8x8xf32>
    %62 = arith.mulf %57, %61 : vector<8x8xf32>
    %63 = arith.truncf %62 : vector<8x8xf32> to vector<8x8xbf16>
    %cst_33 = arith.constant dense<0.000000e+00> : vector<8x32xf32>
    %64 = tpu.matmul %63, %51, %cst_33 {dimension_numbers = #tpu.dot_dimension_numbers<[1], [0], [0], [1], [0, 0, 1, 1], [], []>} : vector<8x8xbf16>, vector<8x32xbf16>, vector<8x32xf32> -> vector<8x32xf32>
    %65 = arith.truncf %64 : vector<8x32xf32> to vector<8x32xbf16>
    %c0_34 = arith.constant 0 : index
    %c64_35 = arith.constant 64 : index
    %66 = vector.load %arg12[%c0_34, %c64_35] : memref<8x128xbf16, #tpu.memory_space<vmem>>, vector<8x32xbf16>
    tpu.vector_store %arg12[%c0_34, %c64_35], %65 {strides = array<i32>} : memref<8x128xbf16, #tpu.memory_space<vmem>>, vector<8x32xbf16>,
    %67 = vector.extract_strided_slice %12 {offsets = [0, 96], sizes = [8, 32], strides = [1, 1]} : vector<8x128xbf16> to vector<8x32xbf16>
    %c0_36 = arith.constant 0 : index
    %c96 = arith.constant 96 : index
    %68 = vector.load %arg10[%c0_36, %c96] : memref<8x128xbf16, #tpu.memory_space<vmem>>, vector<8x32xbf16>
    %c0_37 = arith.constant 0 : index
    %c96_38 = arith.constant 96 : index
    %69 = vector.load %arg11[%c0_37, %c96_38] : memref<8x128xbf16, #tpu.memory_space<vmem>>, vector<8x32xbf16>
    %cst_39 = arith.constant dense<0.000000e+00> : vector<8x8xf32>
    %70 = tpu.matmul %67, %68, %cst_39 {dimension_numbers = #tpu.dot_dimension_numbers<[1], [1], [0], [0], [0, 0, 1, 0], [], []>} : vector<8x32xbf16>, vector<8x32xbf16>, vector<8x8xf32> -> vector<8x8xf32>
    %cst_40 = arith.constant dense<0xFF800000> : vector<8xf32>
    %71 = vector.multi_reduction <maximumf>, %70, %cst_40 [1] : vector<8x8xf32> to vector<8xf32>
    %72 = vector.shape_cast %71 : vector<8xf32> to vector<8x1xf32>
    %73 = vector.broadcast %72 : vector<8x1xf32> to vector<8x8xf32>
    %74 = arith.subf %70, %73 : vector<8x8xf32>
    %75 = math.exp %74 : vector<8x8xf32>
    %cst_41 = arith.constant dense<0.000000e+00> : vector<8xf32>
    %76 = vector.multi_reduction <add>, %75, %cst_41 [1] : vector<8x8xf32> to vector<8xf32>
    %77 = vector.shape_cast %76 : vector<8xf32> to vector<8x1xf32>
    %78 = tpu.reciprocal %77 {approx = true} : vector<8x1xf32> -> vector<8x1xf32>
    %79 = vector.broadcast %78 : vector<8x1xf32> to vector<8x8xf32>
    %80 = arith.mulf %75, %79 : vector<8x8xf32>
    %81 = arith.truncf %80 : vector<8x8xf32> to vector<8x8xbf16>
    %cst_42 = arith.constant dense<0.000000e+00> : vector<8x32xf32>
    %82 = tpu.matmul %81, %69, %cst_42 {dimension_numbers = #tpu.dot_dimension_numbers<[1], [0], [0], [1], [0, 0, 1, 1], [], []>} : vector<8x8xbf16>, vector<8x32xbf16>, vector<8x32xf32> -> vector<8x32xf32>
    %83 = arith.truncf %82 : vector<8x32xf32> to vector<8x32xbf16>
    %c0_43 = arith.constant 0 : index
    %c96_44 = arith.constant 96 : index
    %84 = vector.load %arg12[%c0_43, %c96_44] : memref<8x128xbf16, #tpu.memory_space<vmem>>, vector<8x32xbf16>
    tpu.vector_store %arg12[%c0_43, %c96_44], %83 {strides = array<i32>} : memref<8x128xbf16, #tpu.memory_space<vmem>>, vector<8x32xbf16>,
    %c0_45 = arith.constant 0 : index
    %c0_46 = arith.constant 0 : index
    %85 = vector.load %arg12[%c0_45, %c0_46] : memref<8x128xbf16, #tpu.memory_space<vmem>>, vector<8x128xbf16>
    %c0_47 = arith.constant 0 : index
    %c0_48 = arith.constant 0 : index
    %86 = vector.load %arg7[%c0_47, %c0_48] : memref<128x128xbf16, #tpu.memory_space<vmem>>, vector<128x128xbf16>
    %cst_49 = arith.constant dense<0.000000e+00> : vector<8x128xf32>
    %87 = tpu.matmul %85, %86, %cst_49 {dimension_numbers = #tpu.dot_dimension_numbers<[1], [0], [0], [1], [0, 0, 1, 1], [], []>} : vector<8x128xbf16>, vector<128x128xbf16>, vector<8x128xf32> -> vector<8x128xf32>
    %c0_50 = arith.constant 0 : index
    %c0_51 = arith.constant 0 : index
    %88 = vector.load %arg8[%c0_50, %c0_51] : memref<1x128xf32, #tpu.memory_space<vmem>>, vector<1x128xf32>
    %89 = vector.broadcast %88 : vector<1x128xf32> to vector<8x128xf32>
    %90 = arith.addf %87, %89 : vector<8x128xf32>
    %c0_52 = arith.constant 0 : index
    %c0_53 = arith.constant 0 : index
    %c0_54 = arith.constant 0 : index
    %c0_55 = arith.constant 0 : index
    %91 = vector.load %arg9[%c0_52, %c0_53, %c0_54, %c0_55] : memref<1x1x8x128xf32, #tpu.memory_space<vmem>>, vector<1x1x8x128xf32>
    %92 = vector.shape_cast %91 : vector<1x1x8x128xf32> to vector<8x128xf32>
    %93 = vector.shape_cast %90 : vector<8x128xf32> to vector<1x1x8x128xf32>
    tpu.vector_store %arg9[%c0_52, %c0_53, %c0_54, %c0_55], %93 {strides = array<i32>} : memref<1x1x8x128xf32, #tpu.memory_space<vmem>>, vector<1x1x8x128xf32>,
    return
  }
  func.func @transform_0(%arg0: i32, %arg1: i32) -> (i32, i32, i32) {
    %c0_i32 = arith.constant 0 : i32
    %c0_i32_0 = arith.constant 0 : i32
    return %arg0, %arg1, %c0_i32 : i32, i32, i32
  }
  func.func @transform_1(%arg0: i32, %arg1: i32) -> (i32, i32, i32) {
    %c0_i32 = arith.constant 0 : i32
    %c0_i32_0 = arith.constant 0 : i32
    %c0_i32_1 = arith.constant 0 : i32
    return %arg0, %c0_i32, %c0_i32_0 : i32, i32, i32
  }
  func.func @transform_2(%arg0: i32, %arg1: i32) -> (i32, i32, i32) {
    %c0_i32 = arith.constant 0 : i32
    %c0_i32_0 = arith.constant 0 : i32
    %c0_i32_1 = arith.constant 0 : i32
    return %arg0, %c0_i32, %c0_i32_0 : i32, i32, i32
  }
  func.func @transform_3(%arg0: i32, %arg1: i32) -> (i32, i32) {
    %c0_i32 = arith.constant 0 : i32
    %c0_i32_0 = arith.constant 0 : i32
    %c0_i32_1 = arith.constant 0 : i32
    return %c0_i32, %c0_i32_0 : i32, i32
  }
  func.func @transform_4(%arg0: i32, %arg1: i32) -> (i32, i32) {
    %c0_i32 = arith.constant 0 : i32
    %c0_i32_0 = arith.constant 0 : i32
    %c0_i32_1 = arith.constant 0 : i32
    return %c0_i32, %c0_i32_0 : i32, i32
  }
  func.func @transform_5(%arg0: i32, %arg1: i32) -> (i32, i32) {
    %c0_i32 = arith.constant 0 : i32
    %c0_i32_0 = arith.constant 0 : i32
    %c0_i32_1 = arith.constant 0 : i32
    return %c0_i32, %c0_i32_0 : i32, i32
  }
  func.func @transform_6(%arg0: i32, %arg1: i32) -> (i32, i32) {
    %c0_i32 = arith.constant 0 : i32
    %c0_i32_0 = arith.constant 0 : i32
    %c0_i32_1 = arith.constant 0 : i32
    return %c0_i32, %c0_i32_0 : i32, i32
  }
  func.func @transform_7(%arg0: i32, %arg1: i32) -> (i32, i32, i32, i32) {
    %c0_i32 = arith.constant 0 : i32
    %c0_i32_0 = arith.constant 0 : i32
    %c0_i32_1 = arith.constant 0 : i32
    return %c0_i32, %arg0, %arg1, %c0_i32_0 : i32, i32, i32, i32
  }
}

</mosaic_0001>

<bundles_post_ra>
// kernel: tpu_custom_call.1
= control target key start
LH: loop header
LB: loop body
LE: loop exit
PB: predicated region body
PF: predicated region fallthrough
CT: control target
= control target key end

     0   :  { %s2573_s0 = inlined_call_operand.hbm [shape: bf16[2,8,128], index: 0, kind: input, shape index: {}]   ;;  %s2574_s1 = inlined_call_operand.hbm [shape: bf16[2,8,128], index: 1, kind: input, shape index: {}]   ;;  %s2575_s2 = inlined_call_operand.hbm [shape: bf16[2,8,128], index: 2, kind: input, shape index: {}]   ;;  %s2576_s3 = inlined_call_operand.hbm [shape: bf16[128,128], index: 3, kind: input, shape index: {}]   ;;  %s2577_s4 = inlined_call_operand.vmem [shape: f32[1,128], index: 4, kind: input, shape index: {}]   ;;  %s2578_s5 = inlined_call_operand.hbm [shape: bf16[128,128], index: 5, kind: input, shape index: {}]   ;;  %s2579_s6 = inlined_call_operand.vmem [shape: f32[1,128], index: 6, kind: input, shape index: {}]   ;;  %s2580_s7 = inlined_call_operand.hbm [shape: f32[1,2,8,128], index: 7, kind: output, shape index: {}]  }
   0x1   :  { %2600 = sst [smem:[#allocation24_spill]] %s2574_s1 }
   0x2   :  { %2601 = sst [smem:[#allocation25_spill]] %s2576_s3 }
   0x3   :  { %2602 = sst [smem:[#allocation26_spill]] %s2578_s5 }
   0x4   :  { %12 = vsyncpa [#allocation6], 0 }
   0x5   :  { %14 = vsyncpa [#allocation6 + $0x1], 0 }
   0x6   :  { %15 = vsyncpa [#allocation9], 0 }
   0x7   :  { %17 = vsyncpa [#allocation9 + $0x1], 0 }
   0x8   :  { %18 = vsyncpa [#allocation12], 0 }
   0x9   :  { %19 = vsyncpa [#allocation7], 0 }
   0xa   :  { %21 = vsyncpa [#allocation7 + $0x1], 0  ;;  %s2138_s24 = smov 0   ;;  %s2140_s25 = smov 0  }
   0xb   :  { %s2142_s26 = smov 0   ;;  %s2144_s27 = smov 0  }
   0xc   :  { %s2146_s28 = smov 0   ;;  %s2148_s29 = smov 0  }
   0xd LB: > { %2603 = sst [smem:[#allocation19_spill]] %s2079_s28  ;;  %s2169_s30 = sadd.s32 4294967295, %s2083_s29   ;;  %s2083_s29 = sphi %s2148_s29, %s27_s29   ;;  %s2079_s28 = sphi %s2146_s28, %s2639_s28   ;;  %s2075_s27 = sphi %s2144_s27, %s2638_s27   ;;  %s2071_s26 = sphi %s2142_s26, %s2642_s26   ;;  %s2067_s25 = sphi %s2140_s25, %s2641_s25   ;;  %s2063_s24 = sphi %s2138_s24, %s2640_s24  }
   0xe   : > { %2604 = sst [smem:[#allocation20_spill]] %s2083_s29  ;;  %s1452_s8 = sadd.s32 4294967294, %s2083_s29  }
   0xf   : > { %p61_p0 = scmp.ne.s32.totalorder %s2067_s25, %s2063_s24  ;;  %p2581_p1 = scmp.eq.s32.totalorder %s2169_s30, 0 }
  0x10   : > { %p229_p3 = scmp.eq.s32.totalorder %s1452_s8, 1  ;;  %p1453_p5 = scmp.ge.s32.totalorder %s2083_s29, 1 }
  0x11   : > { %p2178_p4 = por %p2581_p1, %p61_p0  ;;  %p236_p7 = scmp.lt.s32.totalorder %s2083_s29, 3 }
  0x12   : > { %p2183_p6 = por %p229_p3, %p61_p0  ;;  %s2085_s12 = smov [#allocation11]  }
  0x13   : > { %s2605_s9 = scalar_select %p2178_p4, 1, 0 }
  0x14   : > { %s2606_s10 = scalar_select %p2183_p6, 1, 0 }
  0x15   : > { %p2188_p8 = pnand %p1453_p5, %p236_p7  ;;  %s248_s13 = sshll.u32 %s2085_s12, 4  ;;  %s249_s13 = int_to_ptr.vmem [resolvable:$true] %s248_s13 }
  0x16   : > { %2607 = sst [smem:[#allocation21_spill]] %s2606_s10  ;;  %s39_s15 = sadd.s32 1, %s2079_s28 }
  0x17   : > { %s2608_s11 = scalar_select %p2188_p8, 1, 0 }
  0x18   : > { %p1717_p9 = pneg %p2188_p8  ;;  %s2610_s3 = sld [smem:[#allocation25_spill]] }
  0x1a   : > { %p2197_p11 = pnand %p1717_p9, %p2581_p1 }
  0x1c   : > { %s2609_s14 = scalar_select %p2197_p11, 1, 0 }
  0x1d   : > { %p2592_p13 = pneg %p2197_p11 }
  0x1e   : > { %s1847_s18 = scalar_lea.hbm %s2610_s3, 1024 }
  0x1f   : > { %p1848_p12 = scmp.ne.s32.totalorder %s2610_s3, %s1847_s18  ;;  %p1854_p5 = scmp.lt.u32.totalorder %s1847_s18, %s2610_s3 }
  0x21   : > { %p1850_p0 = pnand %p2592_p13, %p1848_p12 }
  0x23   : > { %p1851_p3 = pneg %p1850_p0 }
  0x25   : > { %p1856_p7 = pnand %p1854_p5, %p1851_p3 }
  0x27   : > { %1859 = shalt.err (!%p1856_p7)
}
  0x28   : > { %s1860_s23 = scalar_lea.vmem %s249_s13, 1024  ;;  %p1868_p2 = scmp.lt.s32.totalorder %s249_s13, %s249_s13 }
  0x29   : > { %p1861_p9 = scmp.ne.s32.totalorder %s249_s13, %s1860_s23  ;;  %p1869_p6 = scmp.lt.s32.totalorder %s1860_s23, %s1860_s23 }
  0x2b   : > { %p1863_p10 = pnand %p1861_p9, %p2592_p13  ;;  %p1870_p4 = por %p1869_p6, %p1868_p2 }
  0x2d   : > { %p1864_p1 = pneg %p1863_p10 }
  0x2f   : > { %p1871_p8 = pnand %p1870_p4, %p1864_p1 }
  0x31   : > { %1874 = shalt.err (!%p1871_p8)
}
  0x32   : > { %s2584_s8 = smov 64   ;;  %s2585_s12 = smov 4  }
  0x33   : > { %1720 = dma.hbm_to_vmem [thread:$0]  (!%p2197_p11), %s2610_s3, 1024, %s249_s13, [#allocation12], %s2584_s8, %s2584_s8, %s2585_s12  }
  0x34   : > { %p41_p1 = scmp.ge.s32.totalorder %s39_s15, 2  ;;  %s48_s18 = sadd.s32 1, %s2071_s26 }
  0x35   : > { %p55_p2 = scmp.ne.s32.totalorder %s2071_s26, %s2067_s25  ;;  %p56_p4 = scmp.eq.s32.totalorder %s2083_s29, 0 }
  0x36   : > { %s2644_s15 = smov (%p41_p1, %s39_s15), 0  ;;  %p2612_p8 = scmp.eq.s32.totalorder %s2169_s30, 1 }
  0x37   : > { %2611 = sst [smem:[#allocation22_spill]] %s2644_s15  ;;  %p57_p6 = por %p56_p4, %p55_p2 }
  0x38   : > { %p2235_p10 = por %p2612_p8, %p55_p2  ;;  %s43_s20 = ssub.s32 %s2079_s28, %s2644_s15 }
  0x39   : > { %p1740_p12 = scmp.lt.s32.totalorder %s2083_s29, 2  ;;  %p46_p0 = scmp.eq.s32.totalorder %s43_s20, 0 }
  0x3a   : > { %s2613_s19 = scalar_select %p2235_p10, 1, 0 }
  0x3b   : > { %s2586_s21 = sand.u32 1, %s2071_s26   ;;  %s2248_s22 = sshll.u32 %s2079_s28, 6 }
  0x3c   : > { %s2245_s13 = sshll.u32 %s2586_s21, 2  ;;  %p2253_p3 = pnand %p1740_p12, %p57_p6 }
  0x3d   : > { %s2251_s23 = scalar_select %p46_p0, %s2071_s26, %s48_s18  }
  0x3e   : > { %s2615_s16 = scalar_select %p2253_p3, 1, 0 }
  0x3f   : > { %2614 = sst [smem:[#allocation23_spill]] %s2251_s23  ;;  %s300_s17 = sand.u32 1, %s2083_s29  }
  0x40   : > { %s2616_s1 = sld [smem:[#allocation24_spill]]  ;;  %s304_s21 = scalar_lea.vmem [#allocation8], %s2245_s13 }
  0x41   : > { %s311_s3 = sshll.u32 %s304_s21, 4  ;;  %s2088_s18 = smov [#allocation13]   ;;  %s2265_s3 = int_to_ptr.vmem [resolvable:$true] %s311_s3 }
  0x42   : > { %s2267_s15 = sshll.u32 %s2088_s18, 4  ;;  %s2269_s28 = scalar_lea.sflag [#allocation9], %s300_s17  ;;  %s265_s15 = int_to_ptr.vmem [resolvable:$true] %s2267_s15 }
  0x43   : > { %p2275_p7 = pneg %p2253_p3 }
  0x45   : > { %s2617_s8 = scalar_select %p2275_p7, 1, 0 }
  0x46   : > { %s2262_s20 = scalar_lea.hbm %s2616_s1, %s2248_s22  ;;  %s1880_s29 = scalar_lea.hbm %s2616_s1, 128 }
  0x47   : > { %s1875_s23 = scalar_lea.hbm %s2262_s20, 64  ;;  %p1881_p2 = scmp.lt.u32.totalorder %s2262_s20, %s2616_s1 }
  0x48   : > { %p1876_p5 = scmp.ne.s32.totalorder %s2262_s20, %s1875_s23  ;;  %p1882_p4 = scmp.lt.u32.totalorder %s1880_s29, %s1875_s23 }
  0x49   : > { %p1884_p8 = scmp.lt.u32.totalorder %s1875_s23, %s2262_s20 }
  0x4a   : > { %p1878_p9 = pnand %p2275_p7, %p1876_p5  ;;  %p1883_p6 = por %p1882_p4, %p1881_p2 }
  0x4c   : > { %p1879_p1 = pneg %p1878_p9  ;;  %p1885_p12 = por %p1884_p8, %p1883_p6 }
  0x4e   : > { %p1886_p0 = pnand %p1885_p12, %p1879_p1 }
  0x50   : > { %1889 = shalt.err (!%p1886_p0)
}
  0x51   : > { %s1890_s17 = scalar_lea.vmem %s2265_s3, 64  ;;  %s2089_s12 = smov [#allocation8]  }
  0x52   : > { %p1891_p5 = scmp.ne.s32.totalorder %s2265_s3, %s1890_s17  ;;  %s1895_s21 = sshll.u32 %s2089_s12, 4  ;;  %s1896_s21 = int_to_ptr.vmem [resolvable:$false] %s1895_s21 }
  0x53   : > { %s1897_s10 = scalar_lea.vmem %s1896_s21, 128  ;;  %p1898_p10 = scmp.lt.s32.totalorder %s2265_s3, %s1896_s21 }
  0x54   : > { %p1893_p9 = pnand %p1891_p5, %p2275_p7  ;;  %p1899_p11 = scmp.lt.s32.totalorder %s1897_s10, %s1890_s17 }
  0x56   : > { %p1894_p13 = pneg %p1893_p9  ;;  %p1900_p2 = por %p1899_p11, %p1898_p10 }
  0x58   : > { %p1901_p4 = pnand %p1900_p2, %p1894_p13 }
  0x5a   : > { %1904 = shalt.err (!%p1901_p4)
}
  0x5b   : > { %1730 = dma.hbm_to_vmem [thread:$0]  (!%p2253_p3), %s2262_s20, 64, %s2265_s3, %s2269_s28  }
  0x5c   : > { %s2618_s5 = sld [smem:[#allocation26_spill]]  ;;  %p2619_p11 = scmp.ne.s32.totalorder %s2609_s14, 0 }
  0x5e   : > { %p2620_p13 = pneg %p2619_p11 }
  0x62   : > { %s1905_s18 = scalar_lea.hbm %s2618_s5, 1024 }
  0x63   : > { %p1906_p1 = scmp.ne.s32.totalorder %s2618_s5, %s1905_s18  ;;  %p1912_p8 = scmp.lt.u32.totalorder %s1905_s18, %s2618_s5 }
  0x65   : > { %p1908_p10 = pnand %p1906_p1, %p2620_p13 }
  0x67   : > { %p1909_p6 = pneg %p1908_p10 }
  0x69   : > { %p1914_p12 = pnand %p1912_p8, %p1909_p6 }
  0x6b   : > { %1917 = shalt.err (!%p1914_p12)
}
  0x6c   : > { %s1918_s3 = scalar_lea.vmem %s265_s15, 1024  ;;  %p2621_p5 = pmov %p2620_p13 }
  0x6d   : > { %p1919_p0 = scmp.ne.s32.totalorder %s265_s15, %s1918_s3  ;;  %p1926_p4 = scmp.lt.s32.totalorder %s265_s15, %s265_s15 }
  0x6e   : > { %p1927_p3 = scmp.lt.s32.totalorder %s1918_s3, %s1918_s3 }
  0x6f   : > { %p1921_p9 = pnand %p1919_p0, %p2621_p5 }
  0x70   : > { %p1928_p7 = por %p1927_p3, %p1926_p4 }
  0x71   : > { %p1922_p2 = pneg %p1921_p9 }
  0x73   : > { %p1929_p1 = pnand %p1928_p7, %p1922_p2 }
  0x75   : > { %1932 = shalt.err (!%p1929_p1)
}
  0x76   : > { %s2622_s1 = smov 4   ;;  %s2623_s20 = smov 64  }
  0x77   : > { %1723 = dma.hbm_to_vmem [thread:$0]  (!%p2619_p11), %s2618_s5, 1024, %s265_s15, [#allocation12], %s2623_s20, %s2623_s20, %s2622_s1  }
  0x78   : > { %s2327_s12 = scalar_lea.hbm %s2573_s0, %s2248_s22  ;;  %s285_s14 = scalar_lea.vmem [#allocation5], %s2245_s13 }
  0x79   : > { %s293_s17 = sshll.u32 %s285_s14, 4  ;;  %s2336_s10 = scalar_lea.hbm %s2575_s2, %s2248_s22  ;;  %s2330_s17 = int_to_ptr.vmem [resolvable:$true] %s293_s17 }
  0x7a   : > { %s2624_s29 = sand.u32 1, %s2071_s26   ;;  %s1933_s1 = scalar_lea.hbm %s2327_s12, 64 }
  0x7b   : > { %s282_s15 = scalar_lea.sflag [#allocation6], %s2624_s29  ;;  %p1934_p3 = scmp.ne.s32.totalorder %s2327_s12, %s1933_s1 }
  0x7c   : > { %p2625_p7 = scmp.ne.s32.totalorder %s2617_s8, 0  ;;  %s1938_s18 = scalar_lea.hbm %s2573_s0, 128 }
  0x7d   : > { %p1939_p10 = scmp.lt.u32.totalorder %s2327_s12, %s2573_s0  ;;  %p1940_p6 = scmp.lt.u32.totalorder %s1938_s18, %s1933_s1 }
  0x7e   : > { %p1936_p11 = pnand %p1934_p3, %p2625_p7  ;;  %p1942_p12 = scmp.lt.u32.totalorder %s1933_s1, %s2327_s12 }
  0x7f   : > { %p1941_p8 = por %p1940_p6, %p1939_p10 }
  0x80   : > { %p1937_p13 = pneg %p1936_p11 }
  0x81   : > { %p1943_p0 = por %p1942_p12, %p1941_p8 }
  0x83   : > { %p1944_p5 = pnand %p1943_p0, %p1937_p13 }
  0x85   : > { %1947 = shalt.err (!%p1944_p5)
}
  0x86   : > { %s1948_s22 = scalar_lea.vmem %s2330_s17, 64  ;;  %s2090_s21 = smov [#allocation5]  }
  0x87   : > { %p1949_p9 = scmp.ne.s32.totalorder %s2330_s17, %s1948_s22  ;;  %s1953_s3 = sshll.u32 %s2090_s21, 4  ;;  %s1954_s3 = int_to_ptr.vmem [resolvable:$false] %s1953_s3 }
  0x88   : > { %s1955_s5 = scalar_lea.vmem %s1954_s3, 128  ;;  %p1956_p1 = scmp.lt.s32.totalorder %s2330_s17, %s1954_s3 }
  0x89   : > { %p1951_p2 = pnand %p1949_p9, %p2625_p7  ;;  %p1957_p3 = scmp.lt.s32.totalorder %s1955_s5, %s1948_s22 }
  0x8b   : > { %p1952_p4 = pneg %p1951_p2  ;;  %p1958_p11 = por %p1957_p3, %p1956_p1 }
  0x8d   : > { %p1959_p10 = pnand %p1958_p11, %p1952_p4 }
  0x8f   : > { %1962 = shalt.err (!%p1959_p10)
}
  0x90   : > { %p2626_p13 = scmp.ne.s32.totalorder %s2615_s16, 0  ;;  %s322_s29 = scalar_lea.vmem [#allocation10], %s2245_s13 }
  0x91   : > { %s329_s1 = sshll.u32 %s322_s29, 4  ;;  %s1963_s20 = scalar_lea.hbm %s2336_s10, 64  ;;  %s330_s1 = int_to_ptr.vmem [resolvable:$true] %s329_s1 }
  0x92   : > { %1727 = dma.hbm_to_vmem [thread:$0]  (!%p2626_p13), %s2327_s12, 64, %s2330_s17, %s282_s15  }
  0x93   : > { %p1964_p6 = scmp.ne.s32.totalorder %s2336_s10, %s1963_s20  ;;  %s1968_s14 = scalar_lea.hbm %s2575_s2, 128 }
  0x94   : > { %p1969_p0 = scmp.lt.u32.totalorder %s2336_s10, %s2575_s2  ;;  %p1970_p5 = scmp.lt.u32.totalorder %s1968_s14, %s1963_s20 }
  0x95   : > { %p1966_p8 = pnand %p1964_p6, %p2625_p7  ;;  %p1972_p2 = scmp.lt.u32.totalorder %s1963_s20, %s2336_s10 }
  0x96   : > { %p1971_p9 = por %p1970_p5, %p1969_p0 }
  0x97   : > { %p1967_p12 = pneg %p1966_p8 }
  0x98   : > { %p1973_p4 = por %p1972_p2, %p1971_p9 }
  0x9a   : > { %p1974_p1 = pnand %p1973_p4, %p1967_p12 }
  0x9c   : > { %1977 = shalt.err (!%p1974_p1)
}
  0x9d   : > { %s1978_s13 = scalar_lea.vmem %s330_s1, 64  ;;  %s2091_s12 = smov [#allocation10]  }
  0x9e   : > { %p1979_p3 = scmp.ne.s32.totalorder %s330_s1, %s1978_s13  ;;  %s1983_s17 = sshll.u32 %s2091_s12, 4  ;;  %s1984_s17 = int_to_ptr.vmem [resolvable:$false] %s1983_s17 }
  0x9f   : > { %s1985_s15 = scalar_lea.vmem %s1984_s17, 128  ;;  %p1986_p6 = scmp.lt.s32.totalorder %s330_s1, %s1984_s17 }
  0xa0   : > { %p1981_p11 = pnand %p1979_p3, %p2625_p7  ;;  %p1987_p8 = scmp.lt.s32.totalorder %s1985_s15, %s1978_s13 }
  0xa2   : > { %p1982_p10 = pneg %p1981_p11  ;;  %p1988_p13 = por %p1987_p8, %p1986_p6 }
  0xa4   : > { %p1989_p0 = pnand %p1988_p13, %p1982_p10 }
  0xa6   : > { %1992 = shalt.err (!%p1989_p0)
}
  0xa7   : > { %p2627_p5 = scmp.ne.s32.totalorder %s2615_s16, 0  ;;  %p2628_p12 = scmp.ne.s32.totalorder %s2608_s11, 0 }
  0xa8   : > { %s2383_s8 = sand.u32 (!%p2628_p12), 1, %s2067_s25   ;;  %p2629_p7 = scmp.ne.s32.totalorder (!%p2628_p12), %s2605_s9, 0 }
  0xa9   : > { %1733 = dma.hbm_to_vmem [thread:$0]  (!%p2627_p5), %s2336_s10, 64, %s330_s1, %s2269_s28  }
  0xaa   : > { %338 = sbr.rel (%p2628_p12) target bundleno = 3169 (0xc61), region = 48  ;;  %s2386_s3 = sshll.u32 (!%p2628_p12), %s2383_s8, 2 }
  0xab   : > { %s341_s5 = scalar_lea.sflag (!%p2628_p12), [#allocation6], %s2383_s8  ;;  %s344_s29 = scalar_lea.vmem (!%p2628_p12), [#allocation5], %s2386_s3 }
  0xb1   : > { %2046 = dma.done.wait (%p2629_p7), %s341_s5, 64  }
  0xb2   : > { %2048 = vsyncadd (%p2629_p7), %s341_s5, 4294967232  ;;  %s349_s28 = sand.u32 1, %s2169_s30   ;;  %s353_s16 = scalar_lea.vmem [#allocation8], %s2386_s3 }
  0xb3   : > { %s350_s11 = scalar_lea.sflag [#allocation9], %s349_s28 }
  0xb4   : > { %2050 = dma.done.wait (%p2629_p7), %s350_s11, 128  }
  0xb5   : > { %2052 = vsyncadd (%p2629_p7), %s350_s11, 4294967168  ;;  %s362_s10 = scalar_lea.vmem [#allocation10], %s2386_s3  ;;  %p2630_p13 = scmp.eq.s32.totalorder %s2169_s30, 0 }
  0xb7   : > { %2054 = dma.done.wait (%p2630_p13), [#allocation12], 2048   ;;  %p2631_p9 = pmov %p2630_p13 }
  0xb8   : > { %v2092_v0 = vmov 0.0   ;;  %vm2093_vm0 = vmmov 0   ;;  %v1801_v1 = vld [vmem:[#allocation11] sm:$0xff]   ;;  %v1802_v2 = vld [vmem:[#allocation11 + $0x8] sm:$0xff]   ;;  %v1803_v3 = vld [vmem:[#allocation11 + $0x10] sm:$0xff]   ;;  %vm689_vm1 = vcmask 261120  }
  0xb9   : > { %2056 = vsyncadd (%p2631_p9), [#allocation12], 4294965248  ;;  %1573 = vmatprep.subr.bf16.mxu0 %v2092_v0  ;;  %1589 = vmatprep.mubr.msk.bf16.mxu0 %vm2093_vm0, %v2092_v0  ;;  %v1804_v4 = vld [vmem:[#allocation11 + $0x18] sm:$0xff]   ;;  %v1805_v5 = vld [vmem:[#allocation11 + $0x20] sm:$0xff]   ;;  %s2094_s1 = smov 96   ;;  %vm752_vm2 = vcmask 1043456  }
  0xba   : > { %1593 = vmatprep.subr.bf16.mxu1 %v2092_v0  ;;  %1609 = vmatprep.mubr.msk.bf16.mxu1 %vm2093_vm0, %v2092_v0  ;;  %v1806_v6 = vld [vmem:[#allocation11 + $0x28] sm:$0xff]   ;;  %v1807_v7 = vld [vmem:[#allocation11 + $0x30] sm:$0xff]   ;;  %v1808_v8 = vld [vmem:[#allocation11 + $0x38] sm:$0xff]   ;;  %vm736_vm3 = vcmask 64512   ;;  %vm797_vm4 = vcmask 257024   ;;  %s2095_s20 = smov 64  }
  0xbb   : > { %1574 = vmatpush3.bf16.msra.mxu0 %v1801_v1  ;;  %1594 = vmatpush3.bf16.msra.mxu1 %v1801_v1  ;;  %v416_v9 = vld [vmem:[%s353_s16] sm:$0xf]  ;;  %v1809_v10 = vld [vmem:[#allocation11] sm:$0xff]   ;;  %v1810_v11 = vld [vmem:[#allocation11 + $0x8] sm:$0xff]   ;;  %s2096_s23 = smov 32   ;;  %vm925_vm5 = vcmask 519424  }
  0xbc   : > { %1575 = vmatprep.subr.bf16.mxu0 %v2092_v0  ;;  %1595 = vmatprep.subr.bf16.mxu1 %v2092_v0  ;;  %v1811_v12 = vld [vmem:[#allocation11 + $0x10] sm:$0xff]   ;;  %v1812_v13 = vld [vmem:[#allocation11 + $0x18] sm:$0xff]   ;;  %v1813_v14 = vld [vmem:[#allocation11 + $0x20] sm:$0xff]   ;;  %vm1052_vm6 = vcmask 781824   ;;  %vm1179_vm7 = vcmask 1044224   ;;  %s1469_s18 = sshll.u32 %s2383_s8, 3 }
  0xbd   : > { %v1814_v15 = vld [vmem:[#allocation11 + $0x28] sm:$0xff]   ;;  %v1815_v16 = vld [vmem:[#allocation11 + $0x30] sm:$0xff]   ;;  %v1816_v17 = vld [vmem:[#allocation11 + $0x38] sm:$0xff]   ;;  %s1515_s21 = sshll.u32 %s2075_s27, 7  ;;  %s410_s13 = scalar_lea.vmem [#allocation14], %s1469_s18 }
  0xbe   : > { %v573_v18 = vld [vmem:[%s344_s29] sm:$0xf]  ;;  %v528_v19 = vld [vmem:[%s362_s10] sm:$0xf]  ;;  %s1309_s12 = sshll.u32 %s410_s13, 4  ;;  %s2524_s3 = scalar_lea.hbm %s2580_s7, %s1515_s21  ;;  %s2526_s12 = int_to_ptr.vmem [resolvable:$true] %s1309_s12 }
  0xbf   : > { %1576 = vmatpush3.bf16.msra.mxu0 %v1802_v2  ;;  %1596 = vmatpush3.bf16.msra.mxu1 %v1802_v2  ;;  %v1470_v20 = vld [vmem:[%s2577_s4] ss:$0 sm:$0xff]  ;;  %s1295_s5 = scalar_lea.sflag [#allocation7], %s2383_s8  ;;  %s1993_s27 = scalar_lea.vmem %s2526_s12, 128 }
  0xc0   : > { %1577 = vmatprep.subr.bf16.mxu0 %v2092_v0  ;;  %1597 = vmatprep.subr.bf16.mxu1 %v2092_v0  ;;  %p1994_p2 = scmp.ne.s32.totalorder %s2526_s12, %s1993_s27  ;;  %p2632_p4 = scmp.ne.s32.totalorder %s2613_s19, 0 }
  0xc1   : > { %s2097_s29 = smov [#allocation14]  }
  0xc2   : > { %p1995_p1 = pnand %p1994_p2, %p2632_p4  ;;  %s1997_s28 = sshll.u32 %s2097_s29, 4  ;;  %s1998_s28 = int_to_ptr.vmem [resolvable:$false] %s1997_s28 }
  0xc3   : > { %1578 = vmatpush3.bf16.msra.mxu0 %v1803_v3  ;;  %1598 = vmatpush3.bf16.msra.mxu1 %v1803_v3  ;;  %s1999_s11 = scalar_lea.vmem %s1998_s28, 256  ;;  %p2000_p11 = scmp.lt.s32.totalorder %s2526_s12, %s1998_s28 }
  0xc4   : > { %1579 = vmatprep.subr.bf16.mxu0 %v2092_v0  ;;  %1599 = vmatprep.subr.bf16.mxu1 %v2092_v0  ;;  %p1996_p3 = pneg %p1995_p1  ;;  %p2001_p10 = scmp.lt.s32.totalorder %s1999_s11, %s1993_s27 }
  0xc6   : > { %p2002_p6 = por %p2001_p10, %p2000_p11 }
  0xc7   : > { %1580 = vmatpush3.bf16.msra.mxu0 %v1804_v4  ;;  %1600 = vmatpush3.bf16.msra.mxu1 %v1804_v4 }
  0xc8   : > { %1581 = vmatprep.subr.bf16.mxu0 %v2092_v0  ;;  %1601 = vmatprep.subr.bf16.mxu1 %v2092_v0  ;;  %p2003_p8 = pnand %p2002_p6, %p1996_p3 }
  0xcb   : > { %1582 = vmatpush3.bf16.msra.mxu0 %v1805_v5  ;;  %1602 = vmatpush3.bf16.msra.mxu1 %v1805_v5 }
  0xcc   : > { %1583 = vmatprep.subr.bf16.mxu0 %v2092_v0  ;;  %1603 = vmatprep.subr.bf16.mxu1 %v2092_v0 }
  0xcf   : > { %1584 = vmatpush3.bf16.msra.mxu0 %v1806_v6  ;;  %1604 = vmatpush3.bf16.msra.mxu1 %v1806_v6 }
  0xd0   : > { %1585 = vmatprep.subr.bf16.mxu0 %v2092_v0  ;;  %1605 = vmatprep.subr.bf16.mxu1 %v2092_v0 }
  0xd3   : > { %1586 = vmatpush3.bf16.msra.mxu0 %v1807_v7  ;;  %1606 = vmatpush3.bf16.msra.mxu1 %v1807_v7 }
  0xd4   : > { %1587 = vmatprep.subr.bf16.mxu0 %v2092_v0  ;;  %1607 = vmatprep.subr.bf16.mxu1 %v2092_v0 }
  0xd7   : > { %1588 = vmatpush3.bf16.msra.mxu0 %v1808_v8  ;;  %1608 = vmatpush3.bf16.msra.mxu1 %v1808_v8 }
  0xd8   : > { %1613 = vmatprep.subr.bf16.mxu0 %v2092_v0  ;;  %1633 = vmatprep.subr.bf16.mxu1 %v2092_v0 }
  0xda   : > { %1590 = vmatmul.mubr.bf16.vlgmr.msra.gmra.mrb[0].mxu0 %v416_v9  ;;  %1610 = vmatmul.mubr.bf16.vlgmr.msra.gmra.mrb[0].mxu1 %v528_v19 }
  0xdb   : > { %1614 = vmatpush3.bf16.msra.mxu0 %v1809_v10  ;;  %1629 = vmatprep.mubr.msk.bf16.mxu0 %vm2093_vm0, %v2092_v0 }
  0xdc   : > { %1615 = vmatprep.subr.bf16.mxu0 %v2092_v0  ;;  %1635 = vmatprep.mubr.msk.bf16.mxu1 %vm2093_vm0, %v2092_v0 }
  0xdf   : > { %1616 = vmatpush3.bf16.msra.mxu0 %v1810_v11 }
  0xe0   : > { %1617 = vmatprep.subr.bf16.mxu0 %v2092_v0 }
  0xe3   : > { %1618 = vmatpush3.bf16.msra.mxu0 %v1811_v12 }
  0xe4   : > { %1619 = vmatprep.subr.bf16.mxu0 %v2092_v0 }
  0xe7   : > { %1620 = vmatpush3.bf16.msra.mxu0 %v1812_v13 }
  0xe8   : > { %1621 = vmatprep.subr.bf16.mxu0 %v2092_v0 }
  0xeb   : > { %1622 = vmatpush3.bf16.msra.mxu0 %v1813_v14 }
  0xec   : > { %1623 = vmatprep.subr.bf16.mxu0 %v2092_v0 }
  0xef   : > { %1624 = vmatpush3.bf16.msra.mxu0 %v1814_v15 }
  0xf0   : > { %1625 = vmatprep.subr.bf16.mxu0 %v2092_v0 }
  0xf3   : > { %1626 = vmatpush3.bf16.msra.mxu0 %v1815_v16 }
  0xf4   : > { %1627 = vmatprep.subr.bf16.mxu0 %v2092_v0 }
  0xf7   : > { %1628 = vmatpush3.bf16.msra.mxu0 %v1816_v17 }
  0xf8   : > { %1681 = vmatprep.subr.bf16.mxu0 %v2092_v0 }
  0xfa   : > { %1630 = vmatmul.mubr.bf16.vlgmr.msra.gmra.mrb[4].mxu0 %v573_v18 }
  0xfb   : > { %1697 = vmatprep.mubr.msk.bf16.mxu0 %vm2093_vm0, %v2092_v0 }
 0x1ad   : > { %v522_v21 = vpop.f32.mrb[0].mxu0  ;;  %v563_v37 = vpop.f32.mrb[0].mxu1 }
 0x1ae   : > { %v523_v22 = vadd.f32 %v1470_v20, %v522_v21  ;;  %v1591_v23 = vpop.f32.mrb[1].mxu0  ;;  %v564_v38 = vadd.f32 %v1470_v20, %v563_v37  ;;  %v1611_v39 = vpop.f32.mrb[1].mxu1 }
 0x1af   : > { %v525_v24 = vpop.f32.mrb[2].mxu0  ;;  %v566_v40 = vpop.f32.mrb[2].mxu1 }
 0x1b0   : > { %v569_v25 = vpack.c.bf16 %v523_v22, %v523_v22  ;;  %v1592_v26 = vpop.f32.mrb[3].mxu0  ;;  %v571_v41 = vpack.c.bf16 %v564_v38, %v564_v38  ;;  %v1612_v42 = vpop.f32.mrb[3].mxu1 }
 0x1b2   : > { %570 = vst [vmem:[#allocation2] sm:$0xf] %v569_v25  ;;  %572 = vst [vmem:[#allocation3] sm:$0xf] %v571_v41 }
 0x1b9   : > { %v687_v27 = vld [vmem:[#allocation2] sm:$0xf]  ;;  %v688_v43 = vld [vmem:[#allocation3] sm:$0xf] }
 0x1ba   : > { %v1817_v28 = vld [vmem:[#allocation2] ss:$0 sps:$4 sm:$0xff]   ;;  %v694_v29 = vsel %vm689_vm1, %v687_v27, 0  ;;  %v754_v44 = vsel %vm752_vm2, %v688_v43, 0  ;;  %v1818_v9 = vld [vmem:[#allocation3] ss:$0 sps:$4 sm:$0xff]  }
 0x1bb   : > { %1634 = vmatpush3.bf16.xpose.msra.mxu1 %v694_v29  ;;  %807 = vrot.lane.b32.xlu1 %v1817_v28, %s2094_s1  ;;  %v1819_v10 = vld [vmem:[#allocation2] ss:$0 sps:$4 sm:$0xff]   ;;  %v1820_v18 = vld [vmem:[#allocation3] ss:$0 sps:$4 sm:$0xff]  }
 0x1bc   : > { %1639 = vmatprep.subr.bf16.mxu1 %v2092_v0  ;;  %v1821_v43 = vld [vmem:[#allocation2] ss:$0 sps:$4 sm:$0xff]  }
 0x1cd   : > { %v679_v30 = vpop.f32.mrb[4].mxu0 }
 0x1ce   : > { %v680_v31 = vadd.f32 %v1470_v20, %v679_v30  ;;  %v1631_v32 = vpop.f32.mrb[5].mxu0 }
 0x1cf   : > { %v682_v33 = vpop.f32.mrb[6].mxu0 }
 0x1d0   : > { %v685_v34 = vmul.f32 0.17677669, %v680_v31  ;;  %v1632_v35 = vpop.f32.mrb[7].mxu0 }
 0x1d2   : > { %v2453_v36 = vpack.c.bf16 %v685_v34, %v685_v34 }
 0x1d4   : > { %802 = vrot.lane.b32.xlu1 %v2453_v36, %s2094_s1  ;;  %1636 = vmatmul.mubr.msk.bf16.vlgmr.msra.gmra.mrb[4].mxu1 %vm689_vm1, %v2453_v36 }
 0x1d5   : > { %1641 = vmatprep.mubr.msk.bf16.mxu1 %vm2093_vm0, %v2092_v0  ;;  %1640 = vmatpush3.bf16.msra.mxu1 %v754_v44 }
 0x1d6   : > { %1645 = vmatprep.subr.bf16.mxu1 %v2092_v0 }
 0x22d   : > { %v808_v58 = vpop.permute.xlu1 %807 }
 0x22e   : > { %v813_v60 = vsel %vm689_vm1, %v808_v58, 0 }
 0x246   : > { %v803_v61 = vpop.permute.xlu1 %802 }
 0x2a7   : > { %v730_v45 = vpop.f32.mrb[4].mxu1 }
 0x2a8   : > { %v1637_v46 = vpop.f32.mrb[5].mxu1  ;;  %v737_v47 = vsel %vm736_vm3, %v730_v45, -inf }
 0x2a9   : > { %738 = vmax.xlane.f32.xlu0 %v737_v47  ;;  %v733_v48 = vpop.f32.mrb[6].mxu1 }
 0x2aa   : > { %v1638_v49 = vpop.f32.mrb[7].mxu1 }
 0x336   : > { %v739_v50 = vpop.xlane.xlu0 %738 }
 0x337   : > { %v740_v51 = vsub.f32 %v730_v45, %v739_v50 }
 0x339   : > { %v741_v52 = vmul.f32 1.442695, %v740_v51 }
 0x33b   : > { %1831 = vpow2.f32 %v741_v52 }
 0x345   : > { %v1832_v53 = vpop.eup %1831 }
 0x346   : > { %v743_v54 = vsel %vm736_vm3, %v1832_v53, 0.0 }
 0x347   : > { %744 = vadd.xlane.f32.xlu0 %v743_v54 }
 0x3d4   : > { %v745_v55 = vpop.xlane.xlu0 %744 }
 0x3d5   : > { %1833 = vrcp.f32 %v745_v55 }
 0x3df   : > { %v1834_v56 = vpop.eup %1833 }
 0x3e0   : > { %v747_v57 = vmul.f32 %v1834_v56, %v1832_v53 }
 0x3e2   : > { %v748_v59 = vpack.c.bf16 %v747_v57, %v747_v57 }
 0x3e4   : > { %1642 = vmatmul.mubr.msk.bf16.vlgmr.msra.gmra.mrb[8].mxu1 %vm736_vm3, %v748_v59  ;;  %v1822_v59 = vld [vmem:[#allocation3] ss:$0 sps:$4 sm:$0xff]  }
 0x3e5   : > { %1646 = vmatpush3.bf16.xpose.msra.mxu1 %v813_v60  ;;  %1647 = vmatprep.mubr.msk.bf16.mxu1 %vm2093_vm0, %v2092_v0 }
 0x3e6   : > { %1651 = vmatprep.subr.bf16.mxu1 %v2092_v0 }
 0x3ec   : > { %1648 = vmatmul.mubr.msk.bf16.vlgmr.msra.gmra.mrb[12].mxu1 %vm689_vm1, %v803_v61 }
 0x3ed   : > { %1653 = vmatprep.mubr.msk.bf16.mxu1 %vm2093_vm0, %v2092_v0 }
 0x4b7   : > { %v790_v62 = vpop.f32.mrb[8].mxu1 }
 0x4b8   : > { %v796_v63 = vpack.c.bf16 %v790_v62, %v790_v62  ;;  %v1643_v1 = vpop.f32.mrb[9].mxu1 }
 0x4b9   : > { %v793_v2 = vpop.f32.mrb[10].mxu1 }
 0x4ba   : > { %798 = vst.msk [vmem:[#allocation4] sm:$0xf] %vm797_vm4, %v796_v63  ;;  %v1644_v3 = vpop.f32.mrb[11].mxu1 }
 0x4bf   : > { %v849_v4 = vpop.f32.mrb[12].mxu1 }
 0x4c0   : > { %v1649_v5 = vpop.f32.mrb[13].mxu1  ;;  %v855_v6 = vsel %vm736_vm3, %v849_v4, -inf }
 0x4c1   : > { %856 = vmax.xlane.f32.xlu0 %v855_v6  ;;  %v852_v7 = vpop.f32.mrb[14].mxu1 }
 0x4c2   : > { %v1650_v8 = vpop.f32.mrb[15].mxu1 }
 0x4d7   : > { %870 = vrot.lane.b32.xlu0 %v1818_v9, %s2094_s1 }
 0x4db   : > { %934 = vrot.lane.b32.xlu0 %v1819_v10, %s2095_s20 }
 0x4df   : > { %929 = vrot.lane.b32.xlu0 %v2453_v36, %s2095_s20 }
 0x54e   : > { %v857_v11 = vpop.xlane.xlu0 %856 }
 0x54f   : > { %v858_v12 = vsub.f32 %v849_v4, %v857_v11 }
 0x551   : > { %v859_v13 = vmul.f32 1.442695, %v858_v12  ;;  %v1823_v12 = vld [vmem:[#allocation13] sm:$0xff]  }
 0x552   : > { %v871_v14 = vpop.permute.xlu0 %870  ;;  %1682 = vmatpush3.bf16.msra.mxu0 %v1823_v12 }
 0x553   : > { %1835 = vpow2.f32 %v859_v13  ;;  %v876_v15 = vsel %vm752_vm2, %v871_v14, 0  ;;  %v1824_v13 = vld [vmem:[#allocation13 + $0x8] sm:$0xff]   ;;  %1683 = vmatprep.subr.bf16.mxu0 %v2092_v0  ;;  %v1825_v14 = vld [vmem:[#allocation13 + $0x10] sm:$0xff]  }
 0x554   : > { %1652 = vmatpush3.bf16.msra.mxu1 %v876_v15  ;;  %v1826_v15 = vld [vmem:[#allocation13 + $0x18] sm:$0xff]  }
 0x555   : > { %1657 = vmatprep.subr.bf16.mxu1 %v2092_v0 }
 0x556   : > { %v935_v22 = vpop.permute.xlu0 %934  ;;  %1684 = vmatpush3.bf16.msra.mxu0 %v1824_v13 }
 0x557   : > { %v940_v24 = vsel %vm689_vm1, %v935_v22, 0  ;;  %1685 = vmatprep.subr.bf16.mxu0 %v2092_v0 }
 0x55a   : > { %v930_v26 = vpop.permute.xlu0 %929  ;;  %1686 = vmatpush3.bf16.msra.mxu0 %v1825_v14 }
 0x55b   : > { %1687 = vmatprep.subr.bf16.mxu0 %v2092_v0 }
 0x55d   : > { %v1836_v16 = vpop.eup %1835 }
 0x55e   : > { %v861_v17 = vsel %vm736_vm3, %v1836_v16, 0.0  ;;  %1688 = vmatpush3.bf16.msra.mxu0 %v1826_v15 }
 0x55f   : > { %862 = vadd.xlane.f32.xlu1 %v861_v17  ;;  %1689 = vmatprep.subr.bf16.mxu0 %v2092_v0  ;;  %v1828_v17 = vld [vmem:[#allocation13 + $0x28] sm:$0xff]  }
 0x570   : > { %997 = vrot.lane.b32.xlu1 %v1820_v18, %s2095_s20  ;;  %v1829_v18 = vld [vmem:[#allocation13 + $0x30] sm:$0xff]  }
 0x5ec   : > { %v863_v19 = vpop.xlane.xlu1 %862 }
 0x5ed   : > { %1837 = vrcp.f32 %v863_v19  ;;  %v1830_v19 = vld [vmem:[#allocation13 + $0x38] sm:$0xff]  }
 0x5f0   : > { %v998_v25 = vpop.permute.xlu1 %997 }
 0x5f1   : > { %v1003_v27 = vsel %vm752_vm2, %v998_v25, 0 }
 0x5f7   : > { %v1838_v20 = vpop.eup %1837 }
 0x5f8   : > { %v865_v21 = vmul.f32 %v1838_v20, %v1836_v16  ;;  %v1827_v16 = vld [vmem:[#allocation13 + $0x20] sm:$0xff]  }
 0x5f9   : > { %1690 = vmatpush3.bf16.msra.mxu0 %v1827_v16 }
 0x5fa   : > { %v866_v23 = vpack.c.bf16 %v865_v21, %v865_v21  ;;  %1691 = vmatprep.subr.bf16.mxu0 %v2092_v0 }
 0x5fc   : > { %1654 = vmatmul.mubr.msk.bf16.vlgmr.msra.gmra.mrb[16].mxu1 %vm736_vm3, %v866_v23 }
 0x5fd   : > { %1658 = vmatpush3.bf16.xpose.msra.mxu1 %v940_v24  ;;  %1659 = vmatprep.mubr.msk.bf16.mxu1 %vm2093_vm0, %v2092_v0 }
 0x5fe   : > { %1663 = vmatprep.subr.bf16.mxu1 %v2092_v0  ;;  %1692 = vmatpush3.bf16.msra.mxu0 %v1828_v17 }
 0x5ff   : > { %1693 = vmatprep.subr.bf16.mxu0 %v2092_v0 }
 0x602   : > { %1694 = vmatpush3.bf16.msra.mxu0 %v1829_v18 }
 0x603   : > { %1695 = vmatprep.subr.bf16.mxu0 %v2092_v0 }
 0x604   : > { %1660 = vmatmul.mubr.msk.bf16.vlgmr.msra.gmra.mrb[20].mxu1 %vm689_vm1, %v930_v26 }
 0x605   : > { %1664 = vmatpush3.bf16.msra.mxu1 %v1003_v27  ;;  %1665 = vmatprep.mubr.msk.bf16.mxu1 %vm2093_vm0, %v2092_v0 }
 0x606   : > { %1669 = vmatprep.subr.bf16.mxu1 %v2092_v0  ;;  %1696 = vmatpush3.bf16.msra.mxu0 %v1830_v19 }
 0x6cf   : > { %v912_v28 = vpop.f32.mrb[16].mxu1 }
 0x6d0   : > { %v1655_v29 = vpop.f32.mrb[17].mxu1  ;;  %v1518_v60 = vpack.c.bf16 %v912_v28, %v912_v28 }
 0x6d1   : > { %v915_v30 = vpop.f32.mrb[18].mxu1 }
 0x6d2   : > { %v1656_v31 = vpop.f32.mrb[19].mxu1 }
 0x6d7   : > { %v976_v32 = vpop.f32.mrb[20].mxu1 }
 0x6d8   : > { %v1661_v33 = vpop.f32.mrb[21].mxu1  ;;  %v982_v34 = vsel %vm736_vm3, %v976_v32, -inf }
 0x6d9   : > { %983 = vmax.xlane.f32.xlu0 %v982_v34  ;;  %v979_v35 = vpop.f32.mrb[22].mxu1 }
 0x6da   : > { %v1662_v37 = vpop.f32.mrb[23].mxu1 }
 0x766   : > { %v984_v38 = vpop.xlane.xlu0 %983 }
 0x767   : > { %v985_v39 = vsub.f32 %v976_v32, %v984_v38 }
 0x769   : > { %v986_v40 = vmul.f32 1.442695, %v985_v39 }
 0x76b   : > { %1839 = vpow2.f32 %v986_v40 }
 0x775   : > { %v1840_v41 = vpop.eup %1839 }
 0x776   : > { %v988_v42 = vsel %vm736_vm3, %v1840_v41, 0.0 }
 0x777   : > { %989 = vadd.xlane.f32.xlu1 %v988_v42 }
 0x788   : > { %1061 = vrot.lane.b32.xlu1 %v1821_v43, %s2096_s23 }
 0x78c   : > { %1056 = vrot.lane.b32.xlu1 %v2453_v36, %s2096_s23 }
 0x804   : > { %v990_v44 = vpop.xlane.xlu1 %989 }
 0x805   : > { %1841 = vrcp.f32 %v990_v44 }
 0x808   : > { %v1062_v47 = vpop.permute.xlu1 %1061 }
 0x809   : > { %v1067_v49 = vsel %vm689_vm1, %v1062_v47, 0 }
 0x80c   : > { %v1057_v50 = vpop.permute.xlu1 %1056 }
 0x80f   : > { %v1842_v45 = vpop.eup %1841 }
 0x810   : > { %v992_v46 = vmul.f32 %v1842_v45, %v1840_v41 }
 0x812   : > { %v993_v48 = vpack.c.bf16 %v992_v46, %v992_v46 }
 0x814   : > { %1666 = vmatmul.mubr.msk.bf16.vlgmr.msra.gmra.mrb[24].mxu1 %vm736_vm3, %v993_v48 }
 0x815   : > { %1670 = vmatpush3.bf16.xpose.msra.mxu1 %v1067_v49  ;;  %1671 = vmatprep.mubr.msk.bf16.mxu1 %vm2093_vm0, %v2092_v0 }
 0x816   : > { %1675 = vmatprep.subr.bf16.mxu1 %v2092_v0 }
 0x81c   : > { %1672 = vmatmul.mubr.msk.bf16.vlgmr.msra.gmra.mrb[28].mxu1 %vm689_vm1, %v1057_v50 }
 0x81d   : > { %1677 = vmatprep.mubr.msk.bf16.mxu1 %vm2093_vm0, %v2092_v0  ;;  %v1505_v0 = vld [vmem:[%s2579_s6] ss:$0 sm:$0xff] }
 0x8e7   : > { %v1039_v36 = vpop.f32.mrb[24].mxu1 }
 0x8e8   : > { %v1667_v51 = vpop.f32.mrb[25].mxu1  ;;  %v1519_v61 = vpack.c.bf16 %v1039_v36, %v1039_v36 }
 0x8e9   : > { %v1042_v52 = vpop.f32.mrb[26].mxu1 }
 0x8ea   : > { %v1668_v53 = vpop.f32.mrb[27].mxu1 }
 0x8ef   : > { %v1103_v54 = vpop.f32.mrb[28].mxu1 }
 0x8f0   : > { %v1673_v55 = vpop.f32.mrb[29].mxu1  ;;  %v1109_v56 = vsel %vm736_vm3, %v1103_v54, -inf }
 0x8f1   : > { %1110 = vmax.xlane.f32.xlu0 %v1109_v56  ;;  %v1106_v57 = vpop.f32.mrb[30].mxu1 }
 0x8f2   : > { %v1674_v58 = vpop.f32.mrb[31].mxu1 }
 0x907   : > { %1124 = vrot.lane.b32.xlu0 %v1822_v59, %s2096_s23 }
 0x90b   : > { %922 = vrot.lane.b32.xlu0 %v1518_v60, %s2096_s23 }
 0x90f   : > { %1049 = vrot.lane.b32.xlu0 %v1519_v61, %s2095_s20 }
 0x97e   : > { %v1111_v62 = vpop.xlane.xlu0 %1110 }
 0x97f   : > { %v1112_v63 = vsub.f32 %v1103_v54, %v1111_v62 }
 0x981   : > { %v1113_v1 = vmul.f32 1.442695, %v1112_v63 }
 0x982   : > { %v1125_v2 = vpop.permute.xlu0 %1124 }
 0x983   : > { %1843 = vpow2.f32 %v1113_v1  ;;  %v1130_v3 = vsel %vm752_vm2, %v1125_v2, 0 }
 0x984   : > { %1676 = vmatpush3.bf16.msra.mxu1 %v1130_v3 }
 0x986   : > { %v923_v4 = vpop.permute.xlu0 %922 }
 0x987   : > { %926 = vst.msk [vmem:[#allocation4] sm:$0xf] %vm925_vm5, %v923_v4 }
 0x98a   : > { %v1050_v5 = vpop.permute.xlu0 %1049 }
 0x98b   : > { %1053 = vst.msk [vmem:[#allocation4] sm:$0xf] %vm1052_vm6, %v1050_v5 }
 0x98d   : > { %v1844_v6 = vpop.eup %1843 }
 0x98e   : > { %v1115_v7 = vsel %vm736_vm3, %v1844_v6, 0.0 }
 0x98f   : > { %1116 = vadd.xlane.f32.xlu1 %v1115_v7 }
 0xa1c   : > { %v1117_v8 = vpop.xlane.xlu1 %1116 }
 0xa1d   : > { %1845 = vrcp.f32 %v1117_v8 }
 0xa27   : > { %v1846_v9 = vpop.eup %1845 }
 0xa28   : > { %v1119_v10 = vmul.f32 %v1846_v9, %v1844_v6 }
 0xa2a   : > { %v1120_v11 = vpack.c.bf16 %v1119_v10, %v1119_v10 }
 0xa2c   : > { %1678 = vmatmul.mubr.msk.bf16.vlgmr.msra.gmra.mrb[32].mxu1 %vm736_vm3, %v1120_v11 }
 0xaff   : > { %v1166_v20 = vpop.f32.mrb[32].mxu1 }
 0xb00   : > { %v1520_v21 = vpack.c.bf16 %v1166_v20, %v1166_v20  ;;  %v1679_v22 = vpop.f32.mrb[33].mxu1 }
 0xb01   : > { %v1169_v23 = vpop.f32.mrb[34].mxu1 }
 0xb02   : > { %1176 = vrot.lane.b32.xlu0 %v1520_v21, %s2094_s1  ;;  %v1680_v24 = vpop.f32.mrb[35].mxu1 }
 0xb74   : > { %v1177_v25 = vpop.permute.xlu0 %1176 }
 0xb75   : > { %1180 = vst.msk [vmem:[#allocation4] sm:$0xf] %vm1179_vm7, %v1177_v25 }
 0xb7c   : > { %v1181_v26 = vld [vmem:[#allocation4] sm:$0xf] }
 0xb7d   : > { %1698 = vmatmul.mubr.bf16.vlgmr.msra.gmra.mrb[8].mxu0 %v1181_v26 }
 0xc50   : > { %v1287_v27 = vpop.f32.mrb[8].mxu0 }
 0xc51   : > { %v1288_v28 = vadd.f32 %v1505_v0, %v1287_v27  ;;  %v1699_v29 = vpop.f32.mrb[9].mxu0 }
 0xc52   : > { %v1290_v30 = vpop.f32.mrb[10].mxu0 }
 0xc53   : > { %1293 = vst [vmem:[%s410_s13] sm:$0xff] %v1288_v28  ;;  %v1700_v31 = vpop.f32.mrb[11].mxu0 }
 0xc54   : > { %2006 = shalt.err (!%p2003_p8)
}
 0xc55   : > { %s2007_s8 = scalar_lea.hbm %s2524_s3, 128  ;;  %s2011_s30 = scalar_lea.hbm %s2580_s7, 256 }
 0xc56   : > { %p2008_p0 = scmp.ne.s32.totalorder %s2524_s3, %s2007_s8  ;;  %p2012_p7 = scmp.lt.u32.totalorder %s2524_s3, %s2580_s7 }
 0xc57   : > { %p2013_p13 = scmp.lt.u32.totalorder %s2011_s30, %s2007_s8  ;;  %p2015_p2 = scmp.lt.u32.totalorder %s2007_s8, %s2524_s3 }
 0xc58   : > { %p2009_p5 = pnand %p2008_p0, %p2632_p4 }
 0xc59   : > { %p2014_p9 = por %p2013_p13, %p2012_p7 }
 0xc5a   : > { %p2010_p12 = pneg %p2009_p5 }
 0xc5b   : > { %p2016_p1 = por %p2015_p2, %p2014_p9 }
 0xc5d   : > { %p2017_p3 = pnand %p2016_p1, %p2010_p12 }
 0xc5f   : > { %2020 = shalt.err (!%p2017_p3)
}
 0xc60   : > { %1715 = dma.vmem_to_hbm [thread:$0]  (%p2632_p4), %s2526_s12, 128, %s2524_s3, %s1295_s5  }
 0xc61 PF: > { %s2633_s20 = sld [smem:[#allocation21_spill]]  ;;  %s2634_s23 = sld [smem:[#allocation20_spill]] }
 0xc62   : > { %s1321_s18 = sand.u32 1, %s2063_s24  }
 0xc63   : > { %s1322_s14 = scalar_lea.sflag [#allocation7], %s1321_s18 }
 0xc67   : > { %p2635_p11 = scmp.ne.s32.totalorder %s2633_s20, 0  ;;  %p2636_p10 = scmp.ge.s32.totalorder %s2634_s23, 2 }
 0xc69   : > { %p1735_p6 = pnand %p2636_p10, %p2635_p11 }
 0xc6b   : > { %2058 = dma.done.wait (!%p1735_p6), %s1322_s14, 128  }
 0xc6c   : > { %2060 = vsyncadd (!%p1735_p6), %s1322_s14, 4294967168  ;;  %s27_s29 = sadd.s32 1, %s2634_s23   ;;  %s2637_s19 = sld [smem:[#allocation23_spill]] }
 0xc6d   : > { %p24_p8 = scmp.ge.s32.totalorder %s27_s29, 4   ;;  %s2638_s27 = sld [smem:[#allocation19_spill]] }
 0xc6e   : > { %s2639_s28 = sld [smem:[#allocation22_spill]]  ;;  %s2640_s24 = smov %s2067_s25 }
 0xc6f   : > { %s2641_s25 = smov %s2071_s26  ;;  %26 = sbr.rel (!%p24_p8) target bundleno = 13 (0xd), region = 129 }
 0xc72   : > { %s2642_s26 = smov %s2637_s19 }
 0xc76   :  { %1327 = vsyncpa [#allocation6], 1 }
 0xc77   :  { %1329 = vsyncpa [#allocation6 + $0x1], 1 }
 0xc78   :  { %1330 = vsyncpa [#allocation9], 1 }
 0xc79   :  { %1332 = vsyncpa [#allocation9 + $0x1], 1 }
 0xc7a   :  { %1333 = vsyncpa [#allocation12], 1 }
 0xc7b   :  { %1334 = vsyncpa [#allocation7], 1 }
 0xc7c   :  { %1336 = vsyncpa [#allocation7 + $0x1], 1 }

</bundles_post_ra>
